<compile_context>
chip_gen: v5e
topology: v5e:2x2
jax: 0.10.0
libtpu: 0.0.40
codegen_flags: <defaults>
</compile_context>

<pallas_src>
import functools

import jax
import jax.numpy as jnp
import numpy as np
from jax.experimental import pallas as pl
from jax.experimental.pallas import tpu as pltpu


# ---------------------------------------------------------------------------
# Kernel: one batch element per grid step
# ---------------------------------------------------------------------------
def conv_upsample_kernel(x_ref, w_ref, b_ref, out_ref, *, H, WC, compute_dtype):
    """
    x_ref  : (1, H, W*C)        lane-folded NHWC input rows
    w_ref  : (3*W*C, 2*W2*C)    folded (upsample + conv3x3 + zero-pad) weight, bf16
    b_ref  : (1, 2*W2*C)        bias pre-tiled to the output lane layout, f32
    out_ref: (1, H, 2*W2*C)     row i = [even output row 2i | odd output row 2i+1]
    """
    xin = x_ref[0].astype(compute_dtype)                          # (H, WC)
    zrow = jnp.zeros((1, WC), compute_dtype)
    prev = jnp.concatenate([zrow, xin[: H - 1, :]], axis=0)       # row i -> x row i-1 (0 at i=0)
    nxt = jnp.concatenate([xin[1:, :], zrow], axis=0)             # row i -> x row i+1 (0 at i=H-1)
    lhs = jnp.concatenate([prev, xin, nxt], axis=1)               # (H, 3*WC)

    # single lane-dense MXU matmul; result lands directly in store layout
    y = jnp.dot(lhs, w_ref[...], preferred_element_type=jnp.float32)   # (H, 2*W2*C)
    y = y + b_ref[...]                                            # full-lane VPU add
    out_ref[...] = y[None].astype(out_ref.dtype)


# ---------------------------------------------------------------------------
# Host-side weight fold: nearest-x2 upsample + 3x3 conv (pad=1) -> banded matrix
# ---------------------------------------------------------------------------
def _fold_weight(w_oihw, W):
    """Build Wf with
         Wf[seg*W*C + j*C + ci, a*W2*C + q*C + co]
       so that for output row p = 2i + a:
         y[p, q, co] = sum_{seg,j,ci} LHS[i, seg*W*C + j*C + ci] * Wf[..., ...]
       where LHS[i] = [x_row(i-1) | x_row(i) | x_row(i+1)] (zero-padded rows at the ends).
       The zero padding in W is encoded by leaving the corresponding columns zero."""
    w = np.asarray(w_oihw, dtype=np.float32)                      # (Cout, Cin, 3, 3)
    C = w.shape[0]
    WC = W * C
    W2 = 2 * W
    W2C = W2 * C
    Wf = np.zeros((3 * WC, 2 * W2C), dtype=np.float32)
    for a in (0, 1):                                              # even / odd output-row plane
        for dy in range(3):
            off = a + dy - 1                                      # upsampled-row offset vs. 2i
            seg = 0 if off == -1 else (1 if off in (0, 1) else 2)  # which LHS row segment
            for dx in range(3):
                for q in range(W2):
                    s = q + dx - 1
                    if s < 0 or s >= W2:                          # zero pad in W -> zero column
                        continue
                    j = s // 2                                    # nearest-upsample source col
                    Wf[seg * WC + j * C: seg * WC + (j + 1) * C,
                       a * W2C + q * C: a * W2C + (q + 1) * C] += w[:, :, dy, dx].T  # [ci, co]
    return Wf


# ---------------------------------------------------------------------------
# Wrapper
# ---------------------------------------------------------------------------
def conv_upsample_pallas(x_nchw, w_oihw, bias, *, compute_dtype=jnp.bfloat16):
    B, C, H, W = x_nchw.shape
    H2, W2 = 2 * H, 2 * W
    WC = W * C
    W2C = W2 * C

    # NCHW -> NHWC -> fold W*C onto the lane axis
    x_fold = jnp.transpose(x_nchw, (0, 2, 3, 1)).reshape(B, H, WC)

    # folded weight (upsample + conv + border) and pre-tiled bias
    w_fold = jnp.asarray(_fold_weight(w_oihw, W), dtype=compute_dtype)       # (3*WC, 2*W2C)
    b_row = jnp.tile(bias.astype(jnp.float32), 2 * W2).reshape(1, 2 * W2C)   # (1, 2*W2C)

    kernel = functools.partial(conv_upsample_kernel, H=H, WC=WC,
                               compute_dtype=compute_dtype)

    out_fold = pl.pallas_call(
        kernel,
        out_shape=jax.ShapeDtypeStruct((B, H, 2 * W2C), x_nchw.dtype),
        grid_spec=pltpu.PrefetchScalarGridSpec(
            num_scalar_prefetch=0,
            grid=(B,),
            in_specs=[
                pl.BlockSpec((1, H, WC), lambda n: (n, 0, 0)),        # x rows (lane-folded)
                pl.BlockSpec((3 * WC, 2 * W2C), lambda n: (0, 0)),    # folded banded weight
                pl.BlockSpec((1, 2 * W2C), lambda n: (0, 0)),         # pre-tiled bias
            ],
            out_specs=pl.BlockSpec((1, H, 2 * W2C), lambda n: (n, 0, 0)),
        ),
        compiler_params=pltpu.CompilerParams(
            dimension_semantics=("parallel",)),                       # megacore on v7x
    )(x_fold, w_fold, b_row)

    # (B, H, [even|odd]*W2*C) -> (B, H2, W2, C) (pure row-major merge) -> NCHW
    out_nhwc = out_fold.reshape(B, H2, W2, C)
    return jnp.transpose(out_nhwc, (0, 3, 1, 2))


# ---------------------------------------------------------------------------
# Pure-JAX reference (for verification)
# ---------------------------------------------------------------------------
def conv_upsample_ref(x_nchw, w_oihw, bias):
    B, C, H, W = x_nchw.shape
    x = jnp.transpose(x_nchw, (0, 2, 3, 1))                            # NHWC
    x_up = jnp.repeat(jnp.repeat(x, 2, axis=1), 2, axis=2)             # nearest x2
    w_hwio = jnp.transpose(w_oihw, (2, 3, 1, 0))
    y = jax.lax.conv_general_dilated(
        x_up, w_hwio, window_strides=(1, 1), padding=((1, 1), (1, 1)),
        dimension_numbers=("NHWC", "HWIO", "NHWC"))
    y = y + bias.reshape(1, 1, 1, C)
    return jnp.transpose(y, (0, 3, 1, 2))


# ---------------------------------------------------------------------------
if __name__ == "__main__":
    key = jax.random.PRNGKey(0)
    kx, kw, kb = jax.random.split(key, 3)

    B, C, H, W = 2, 4, 16, 16                        # channels=4, dims=2, use_conv=True
    x = jax.random.normal(kx, (B, C, H, W), jnp.float32)               # NCHW, like PyTorch
    w = 0.1 * jax.random.normal(kw, (C, C, 3, 3), jnp.float32)         # OIHW conv weight
    b = 0.1 * jax.random.normal(kb, (C,), jnp.float32)

    out = conv_upsample_pallas(x, w, b)
    out = jax.block_until_ready(out)

    ref = conv_upsample_ref(x, w, b)
    # bf16 matmul operands (f32 accumulation) -> relaxed tolerance.
    np.testing.assert_allclose(np.asarray(out), np.asarray(ref), rtol=2e-2, atol=3e-2)
    print("KERNEL_OK")
</pallas_src>

<mosaic_0001>
module attributes {stable_mosaic.version = 11 : i64} {
  func.func @conv_upsample_kernel(%arg0: i32, %arg1: memref<1x16x64xf32, #tpu.memory_space<vmem>>, %arg2: memref<192x256xbf16, #tpu.memory_space<vmem>>, %arg3: memref<1x256xf32, #tpu.memory_space<vmem>>, %arg4: memref<1x16x256xf32, #tpu.memory_space<vmem>>) attributes {dimension_semantics = [#tpu.dimension_semantics<parallel>], iteration_bounds = array<i64: 2>, scalar_prefetch = 0 : i64, scratch_operands = 0 : i64, tpu.core_type = #tpu.core_type<tc>, window_params = [{transform_indices = @transform_0, window_bounds = array<i64: 1, 16, 64>}, {pipeline_mode = #tpu.pipeline_mode<synchronous>, transform_indices = @transform_1, window_bounds = array<i64: 192, 256>}, {pipeline_mode = #tpu.pipeline_mode<synchronous>, transform_indices = @transform_2, window_bounds = array<i64: 1, 256>}, {transform_indices = @transform_3, window_bounds = array<i64: 1, 16, 256>}]} {
    %c0 = arith.constant 0 : index
    %c0_0 = arith.constant 0 : index
    %c0_1 = arith.constant 0 : index
    %0 = vector.load %arg1[%c0, %c0_0, %c0_1] : memref<1x16x64xf32, #tpu.memory_space<vmem>>, vector<1x16x64xf32>
    %1 = vector.shape_cast %0 : vector<1x16x64xf32> to vector<16x64xf32>
    %2 = arith.truncf %1 : vector<16x64xf32> to vector<16x64xbf16>
    %cst = arith.constant 0.000000e+00 : bf16
    %3 = vector.broadcast %cst : bf16 to vector<1x64xbf16>
    %4 = vector.extract_strided_slice %2 {offsets = [0, 0], sizes = [15, 64], strides = [1, 1]} : vector<16x64xbf16> to vector<15x64xbf16>
    %5 = tpu.concatenate %3, %4 in 0 : vector<1x64xbf16>, vector<15x64xbf16> -> vector<16x64xbf16>
    %6 = vector.extract_strided_slice %2 {offsets = [1, 0], sizes = [15, 64], strides = [1, 1]} : vector<16x64xbf16> to vector<15x64xbf16>
    %7 = tpu.concatenate %6, %3 in 0 : vector<15x64xbf16>, vector<1x64xbf16> -> vector<16x64xbf16>
    %8 = tpu.concatenate %5, %2, %7 in 1 : vector<16x64xbf16>, vector<16x64xbf16>, vector<16x64xbf16> -> vector<16x192xbf16>
    %c0_2 = arith.constant 0 : index
    %c0_3 = arith.constant 0 : index
    %9 = vector.load %arg2[%c0_2, %c0_3] : memref<192x256xbf16, #tpu.memory_space<vmem>>, vector<192x256xbf16>
    %cst_4 = arith.constant dense<0.000000e+00> : vector<16x256xf32>
    %10 = tpu.matmul %8, %9, %cst_4 {dimension_numbers = #tpu.dot_dimension_numbers<[1], [0], [0], [1], [0, 0, 1, 1], [], []>} : vector<16x192xbf16>, vector<192x256xbf16>, vector<16x256xf32> -> vector<16x256xf32>
    %c0_5 = arith.constant 0 : index
    %c0_6 = arith.constant 0 : index
    %11 = vector.load %arg3[%c0_5, %c0_6] : memref<1x256xf32, #tpu.memory_space<vmem>>, vector<1x256xf32>
    %12 = vector.broadcast %11 : vector<1x256xf32> to vector<16x256xf32>
    %13 = arith.addf %10, %12 : vector<16x256xf32>
    %14 = vector.shape_cast %13 : vector<16x256xf32> to vector<1x16x256xf32>
    %c0_7 = arith.constant 0 : index
    %c0_8 = arith.constant 0 : index
    %c0_9 = arith.constant 0 : index
    %15 = vector.load %arg4[%c0_7, %c0_8, %c0_9] : memref<1x16x256xf32, #tpu.memory_space<vmem>>, vector<1x16x256xf32>
    tpu.vector_store %arg4[%c0_7, %c0_8, %c0_9], %14 {strides = array<i32>} : memref<1x16x256xf32, #tpu.memory_space<vmem>>, vector<1x16x256xf32>,
    return
  }
  func.func @transform_0(%arg0: i32) -> (i32, i32, i32) {
    %c0_i32 = arith.constant 0 : i32
    %c0_i32_0 = arith.constant 0 : i32
    %c0_i32_1 = arith.constant 0 : i32
    return %arg0, %c0_i32, %c0_i32_0 : i32, i32, i32
  }
  func.func @transform_1(%arg0: i32) -> (i32, i32) {
    %c0_i32 = arith.constant 0 : i32
    %c0_i32_0 = arith.constant 0 : i32
    %c0_i32_1 = arith.constant 0 : i32
    return %c0_i32, %c0_i32_0 : i32, i32
  }
  func.func @transform_2(%arg0: i32) -> (i32, i32) {
    %c0_i32 = arith.constant 0 : i32
    %c0_i32_0 = arith.constant 0 : i32
    %c0_i32_1 = arith.constant 0 : i32
    return %c0_i32, %c0_i32_0 : i32, i32
  }
  func.func @transform_3(%arg0: i32) -> (i32, i32, i32) {
    %c0_i32 = arith.constant 0 : i32
    %c0_i32_0 = arith.constant 0 : i32
    %c0_i32_1 = arith.constant 0 : i32
    return %arg0, %c0_i32, %c0_i32_0 : i32, i32, i32
  }
}

</mosaic_0001>

<bundles_post_ra>
// kernel: tpu_custom_call.1
= control target key start
LH: loop header
LB: loop body
LE: loop exit
PB: predicated region body
PF: predicated region fallthrough
CT: control target
= control target key end

     0   :  { %8 = vsyncpa [#allocation3], 0  ;;  %s1139_s0 = inlined_call_operand.hbm [shape: f32[2,16,64], index: 0, kind: input, shape index: {}]   ;;  %s1140_s1 = inlined_call_operand.hbm [shape: bf16[192,256], index: 1, kind: input, shape index: {}]   ;;  %s1141_s2 = inlined_call_operand.hbm [shape: f32[1,256], index: 2, kind: input, shape index: {}]   ;;  %s1142_s3 = inlined_call_operand.hbm [shape: f32[2,16,256], index: 3, kind: output, shape index: {}]  }
   0x1   :  { %10 = vsyncpa [#allocation3 + $0x1], 0 }
   0x2   :  { %11 = vsyncpa [#allocation6], 0 }
   0x3   :  { %12 = vsyncpa [#allocation4], 0 }
   0x4   :  { %14 = vsyncpa [#allocation4 + $0x1], 0  ;;  %s982_s12 = smov 0   ;;  %s984_s13 = smov 0  }
   0x5   :  { %s986_s14 = smov 0   ;;  %s988_s15 = smov 0  }
   0x6 LB: > { %s1003_s16 = sadd.s32 4294967295, %s953_s15   ;;  %s579_s17 = sadd.s32 4294967294, %s953_s15   ;;  %s953_s15 = sphi %s988_s15, %s1152_s15   ;;  %s949_s14 = sphi %s986_s14, %s1151_s14   ;;  %s945_s13 = sphi %s984_s13, %s1150_s13   ;;  %s941_s12 = sphi %s982_s12, %s1149_s12  }
   0x7   : > { %p40_p0 = scmp.ne.s32.totalorder %s945_s13, %s941_s12  ;;  %p41_p1 = scmp.eq.s32.totalorder %s1003_s16, 0 }
   0x8   : > { %p106_p2 = scmp.eq.s32.totalorder %s1003_s16, 1  ;;  %p112_p3 = scmp.eq.s32.totalorder %s579_s17, 1 }
   0x9   : > { %p1012_p4 = por %p41_p1, %p40_p0  ;;  %p580_p5 = scmp.ge.s32.totalorder %s953_s15, 1 }
   0xa   : > { %p1017_p6 = por %p112_p3, %p40_p0  ;;  %p119_p7 = scmp.lt.s32.totalorder %s953_s15, 3 }
   0xb   : > { %s130_s22 = sshll.u32 %s1140_s1, 4  ;;  %s955_s24 = smov [#allocation5]   ;;  %s131_s22 = int_to_ptr.hbm [resolvable:$true] %s130_s22 }
   0xc   : > { %p1025_p8 = pnand %p580_p5, %p119_p7  ;;  %s132_s25 = sshll.u32 %s955_s24, 4  ;;  %s133_s25 = int_to_ptr.vmem [resolvable:$true] %s132_s25 }
   0xd   : > { %s145_s28 = sshll.u32 %s1141_s2, 4  ;;  %s956_s29 = smov 128   ;;  %s146_s28 = int_to_ptr.hbm [resolvable:$true] %s145_s28 }
   0xe   : > { %p733_p9 = pneg %p1025_p8  ;;  %s957_s30 = smov 8  }
   0xf   : > { %s958_s4 = smov [#allocation7]   ;;  %s1041_s6 = sadd.s32 1, %s953_s15  }
  0x10   : > { %p734_p10 = pnand %p733_p9, %p41_p1  ;;  %s147_s5 = sshll.u32 %s958_s4, 4  ;;  %s148_s5 = int_to_ptr.vmem [resolvable:$true] %s147_s5 }
  0x11   : > { %s27_s7 = sadd.s32 1, %s949_s14  ;;  %s24_s8 = ssub.s32 %s953_s15, %s1041_s6 }
  0x12   : > { %736 = dma.hbm_to_vmem [thread:$0]  (!%p734_p10), %s131_s22, 3072, %s133_s25, [#allocation6], %s956_s29, %s956_s29, %s957_s30  }
  0x13   : > { %739 = dma.hbm_to_vmem [thread:$0]  (!%p734_p10), %s146_s28, 32, %s148_s5, [#allocation6]  }
  0x14   : > { %p34_p12 = scmp.ne.s32.totalorder %s949_s14, %s945_s13  ;;  %p25_p13 = scmp.eq.s32.totalorder %s24_s8, 0 }
  0x15   : > { %p35_p0 = scmp.eq.s32.totalorder %s953_s15, 0  ;;  %p750_p5 = scmp.lt.s32.totalorder %s953_s15, 2 }
  0x16   : > { %p1051_p3 = por %p106_p2, %p34_p12  ;;  %s158_s11 = sand.u32 1, %s949_s14  }
  0x17   : > { %s1057_s10 = scalar_select %p25_p13, %s949_s14, %s27_s7  }
  0x18   : > { %p36_p7 = por %p35_p0, %p34_p12  ;;  %s584_s17 = sshll.u32 %s158_s11, 4 }
  0x19   : > { %s695_s20 = sshll.u32 %s953_s15, 4  ;;  %s162_s25 = scalar_lea.vmem [#allocation2], %s584_s17 }
  0x1a   : > { %s167_s24 = scalar_lea.hbm %s1139_s0, %s695_s20  ;;  %s170_s26 = sshll.u32 %s162_s25, 4  ;;  %s171_s26 = int_to_ptr.vmem [resolvable:$true] %s170_s26 }
  0x1b   : > { %s168_s27 = sshll.u32 %s167_s24, 4  ;;  %p1064_p2 = pnand %p750_p5, %p36_p7  ;;  %s169_s27 = int_to_ptr.hbm [resolvable:$true] %s168_s27 }
  0x1c   : > { %s159_s4 = scalar_lea.sflag [#allocation3], %s158_s11  ;;  %s853_s5 = sshra.s32 %s169_s27, 4  ;;  %s854_s5 = int_to_ptr.hbm [resolvable:$true] %s853_s5 }
  0x1d   : > { %s855_s7 = scalar_lea.hbm %s854_s5, 16  ;;  %p857_p10 = pneg %p1064_p2 }
  0x1e   : > { %p856_p9 = scmp.ne.s32.totalorder %s854_s5, %s855_s7  ;;  %s860_s20 = scalar_lea.hbm %s1139_s0, 32 }
  0x1f   : > { %p861_p0 = scmp.lt.s32.totalorder %s854_s5, %s1139_s0  ;;  %p862_p5 = scmp.lt.s32.totalorder %s860_s20, %s855_s7 }
  0x20   : > { %p858_p12 = pnand %p857_p10, %p856_p9 }
  0x21   : > { %p863_p7 = por %p862_p5, %p861_p0 }
  0x22   : > { %p859_p13 = pneg %p858_p12 }
  0x24   : > { %p864_p11 = pnand %p863_p7, %p859_p13 }
  0x26   : > { %867 = shalt.err (!%p864_p11)
}
  0x27   : > { %743 = dma.hbm_to_vmem [thread:$0]  (!%p1064_p2), %s169_s27, 256, %s171_s26, %s159_s4, %s956_s29, %s956_s29, %s957_s30  }
  0x28   : > { %182 = sbr.rel (%p1025_p8) target bundleno = 319 (0x13f), region = 32  ;;  %s1084_s11 = sand.u32 (!%p1025_p8), 1, %s945_s13  }
  0x29   : > { %s588_s24 = sshll.u32 (!%p1025_p8), %s1084_s11, 4  ;;  %s185_s25 = scalar_lea.sflag (!%p1025_p8), [#allocation3], %s1084_s11 }
  0x2a   : > { %s188_s5 = scalar_lea.vmem (!%p1025_p8), [#allocation2], %s588_s24 }
  0x2d   : > { %928 = dma.done.wait (%p1012_p4), %s185_s25, 256  }
  0x2e   : > { %930 = vsyncadd (%p1012_p4), %s185_s25, 4294967040 }
  0x2f   : > { %932 = dma.done.wait (%p41_p1), [#allocation6], 3104  }
  0x30   : > { %934 = vsyncadd (%p41_p1), [#allocation6], 4294964192  ;;  %v223_v0 = vld [vmem:[%s188_s5] sm:$0xff]  ;;  %v224_v1 = vld [vmem:[%s188_s5 + $0x8] sm:$0xff]  ;;  %s959_s18 = smov 64   ;;  %vm247_vm1 = vcmask 1047552  }
  0x31   : > { %v650_v2 = vld [vmem:[#allocation5 + $0x70] sm:$0xf]  ;;  %v225_v3 = vpack.c.bf16 %v223_v0, %v223_v0  ;;  %v226_v4 = vpack.c.bf16 %v224_v1, %v224_v1  ;;  %v711_v5 = vld [vmem:[#allocation5 + $0x74] sm:$0xf0]  ;;  %v710_v6 = vld [vmem:[#allocation5 + $0x74] sm:$0xf] }
  0x32   : > { %v652_v7 = vld [vmem:[#allocation5 + $0x78] sm:$0xf0]  ;;  %v651_v8 = vor.u32 %v711_v5, %v650_v2  ;;  %v642_v10 = vld [vmem:[#allocation5 + $0x60] sm:$0xf]  ;;  %v709_v11 = vld [vmem:[#allocation5 + $0x64] sm:$0xf0] }
  0x33   : > { %v655_v9 = vor.u32 %v710_v6, %v652_v7  ;;  %v708_v12 = vld [vmem:[#allocation5 + $0x64] sm:$0xf]  ;;  %v229_v13 = vunpack.c.l.b16 %v225_v3  ;;  %v230_v14 = vunpack.c.l.b16 %v226_v4  ;;  %v644_v15 = vld [vmem:[#allocation5 + $0x68] sm:$0xf0]  ;;  %v643_v16 = vor.u32 %v709_v11, %v642_v10  ;;  %v634_v18 = vld [vmem:[#allocation5 + $0x50] sm:$0xf] }
  0x34   : > { %411 = vmatpush.bf16.msra.mxu0 %v651_v8  ;;  %v647_v17 = vor.u32 %v708_v12, %v644_v15  ;;  %v707_v19 = vld [vmem:[#allocation5 + $0x54] sm:$0xf0]  ;;  %v718_v20 = vld [vmem:[#allocation5 + $0xb4] sm:$0xf]  ;;  %v636_v23 = vld [vmem:[#allocation5 + $0x58] sm:$0xf0] }
  0x35   : > { %439 = vmatpush.bf16.msra.mxu2 %v655_v9  ;;  %v1096_v21 = vpack.c.b16 %v230_v14, %v229_v13  ;;  %v706_v22 = vld [vmem:[#allocation5 + $0x54] sm:$0xf]  ;;  %v684_v24 = vld [vmem:[#allocation5 + $0xb8] sm:$0xf0]  ;;  %v716_v26 = vld [vmem:[#allocation5 + $0xa4] sm:$0xf]  ;;  %v635_v28 = vor.u32 %v707_v19, %v634_v18 }
  0x36   : > { %v687_v25 = vor.u32 %v718_v20, %v684_v24  ;;  %v676_v27 = vld [vmem:[#allocation5 + $0xa8] sm:$0xf0]  ;;  %v639_v29 = vor.u32 %v706_v22, %v636_v23  ;;  %v626_v30 = vld [vmem:[#allocation5 + $0x40] sm:$0xf]  ;;  %v682_v31 = vld [vmem:[#allocation5 + $0xb0] sm:$0xf] }
  0x37   : > { %251 = vrot.lane.b32.xlu0 %v1096_v21, %s959_s18  ;;  %v719_v32 = vld [vmem:[#allocation5 + $0xb4] sm:$0xf0]  ;;  %v705_v33 = vld [vmem:[#allocation5 + $0x44] sm:$0xf0]  ;;  %v704_v34 = vld [vmem:[#allocation5 + $0x44] sm:$0xf]  ;;  %v679_v36 = vor.u32 %v716_v26, %v676_v27 }
  0x38   : > { %412 = vmatpush.bf16.msra.mxu0 %v643_v16  ;;  %457 = vmatpush.bf16.msra.mxu3 %v687_v25  ;;  %v628_v35 = vld [vmem:[#allocation5 + $0x48] sm:$0xf0]  ;;  %v683_v37 = vor.u32 %v719_v32, %v682_v31  ;;  %v714_v38 = vld [vmem:[#allocation5 + $0x94] sm:$0xf]  ;;  %v668_v39 = vld [vmem:[#allocation5 + $0x98] sm:$0xf0]  ;;  %v627_v42 = vor.u32 %v705_v33, %v626_v30 }
  0x39   : > { %440 = vmatpush.bf16.msra.mxu2 %v647_v17  ;;  %v674_v40 = vld [vmem:[#allocation5 + $0xa0] sm:$0xf]  ;;  %v717_v41 = vld [vmem:[#allocation5 + $0xa4] sm:$0xf0]  ;;  %v631_v43 = vor.u32 %v704_v34, %v628_v35  ;;  %v618_v44 = vld [vmem:[#allocation5 + $0x30] sm:$0xf]  ;;  %v671_v49 = vor.u32 %v714_v38, %v668_v39 }
  0x3a   : > { %429 = vmatpush.bf16.msra.mxu1 %v683_v37  ;;  %v703_v45 = vld [vmem:[#allocation5 + $0x34] sm:$0xf0]  ;;  %v702_v46 = vld [vmem:[#allocation5 + $0x34] sm:$0xf]  ;;  %v675_v47 = vor.u32 %v717_v41, %v674_v40  ;;  %v620_v48 = vld [vmem:[#allocation5 + $0x38] sm:$0xf0] }
  0x3b   : > { %v666_v50 = vld [vmem:[#allocation5 + $0x90] sm:$0xf]  ;;  %v715_v51 = vld [vmem:[#allocation5 + $0x94] sm:$0xf0]  ;;  %v712_v52 = vld [vmem:[#allocation5 + $0x84] sm:$0xf]  ;;  %v619_v58 = vor.u32 %v703_v45, %v618_v44  ;;  %v623_v59 = vor.u32 %v702_v46, %v620_v48 }
  0x3c   : > { %413 = vmatpush.bf16.msra.mxu0 %v635_v28  ;;  %458 = vmatpush.bf16.msra.mxu3 %v679_v36  ;;  %v660_v53 = vld [vmem:[#allocation5 + $0x88] sm:$0xf0]  ;;  %v233_v54 = vshrl.u32 %v1096_v21, 16  ;;  %v236_v55 = vshll.u32 %v1096_v21, 16  ;;  %v610_v56 = vld [vmem:[#allocation5 + $0x20] sm:$0xf]  ;;  %v667_v57 = vor.u32 %v715_v51, %v666_v50 }
  0x3d   : > { %441 = vmatpush.bf16.msra.mxu2 %v639_v29  ;;  %vm248_vm0 = vsmask.f32 7424  ;;  %v658_v61 = vld [vmem:[#allocation5 + $0x80] sm:$0xf]  ;;  %v713_v62 = vld [vmem:[#allocation5 + $0x84] sm:$0xf0]  ;;  %v663_v2 = vor.u32 %v712_v52, %v660_v53 }
  0x3e   : > { %430 = vmatpush.bf16.msra.mxu1 %v675_v47  ;;  %v244_v60 = vrot.slane %v236_v55, 1  ;;  %v701_v63 = vld [vmem:[#allocation5 + $0x24] sm:$0xf0]  ;;  %v700_v0 = vld [vmem:[#allocation5 + $0x24] sm:$0xf]  ;;  %vm249_vm2 = vmand %vm247_vm1, %vm248_vm0  ;;  %v659_v4 = vor.u32 %v713_v62, %v658_v61  ;;  %vm253_vm3 = vcmask 523264  }
  0x3f   : > { %v612_v1 = vld [vmem:[#allocation5 + $0x28] sm:$0xf0]  ;;  %v611_v5 = vor.u32 %v701_v63, %v610_v56  ;;  %v602_v7 = vld [vmem:[#allocation5 + $0x10] sm:$0xf]  ;;  %v699_v8 = vld [vmem:[#allocation5 + $0x14] sm:$0xf0] }
  0x40   : > { %414 = vmatpush.bf16.msra.mxu0 %v627_v42  ;;  %459 = vmatpush.bf16.msra.mxu3 %v671_v49  ;;  %v245_v3 = vor.u32 %v244_v60, %v233_v54  ;;  %v615_v6 = vor.u32 %v700_v0, %v612_v1  ;;  %v698_v9 = vld [vmem:[#allocation5 + $0x14] sm:$0xf]  ;;  %v604_v10 = vld [vmem:[#allocation5 + $0x18] sm:$0xf0]  ;;  %v603_v12 = vor.u32 %v699_v8, %v602_v7  ;;  %v594_v14 = vld [vmem:[#allocation5] sm:$0xf] }
  0x41   : > { %442 = vmatpush.bf16.msra.mxu2 %v631_v43  ;;  %v607_v13 = vor.u32 %v698_v9, %v604_v10  ;;  %v697_v15 = vld [vmem:[#allocation5 + $0x4] sm:$0xf0]  ;;  %v696_v16 = vld [vmem:[#allocation5 + $0x4] sm:$0xf]  ;;  %v596_v17 = vld [vmem:[#allocation5 + $0x8] sm:$0xf0] }
  0x42   : > { %431 = vmatpush.bf16.msra.mxu1 %v667_v57  ;;  %v250_v11 = vsel %vm249_vm2, %v245_v3, 0  ;;  %v595_v18 = vor.u32 %v697_v15, %v594_v14  ;;  %v599_v19 = vor.u32 %v696_v16, %v596_v17  ;;  %v235_v20 = vrot.slane %v233_v54, 7  ;;  %v282_v25 = vld [vmem:[#allocation7] sm:$0x3]  ;;  %s591_s23 = sshll.u32 %s1084_s11, 5  ;;  %s720_s30 = sshll.u32 %s1003_s16, 5 }
  0x43   : > { %vm240_vm4 = vcmask 1040384   ;;  %vm241_vm5 = vsmask.f32 256  ;;  %v284_v26 = vperm.slane %v282_v25, 0  ;;  %v285_v31 = vperm.slane %v282_v25, 1  ;;  %s221_s29 = scalar_lea.vmem [#allocation8], %s591_s23  ;;  %s483_s28 = scalar_lea.hbm %s1142_s3, %s720_s30 }
  0x44   : > { %415 = vmatpush.bf16.msra.mxu0 %v619_v58  ;;  %460 = vmatpush.bf16.msra.mxu3 %v663_v2  ;;  %v238_v21 = vor.u32 %v236_v55, %v235_v20  ;;  %vm242_vm6 = vmand %vm240_vm4, %vm241_vm5  ;;  %s484_s4 = sshll.u32 %s221_s29, 4  ;;  %s486_s7 = sshll.u32 %s483_s28, 4  ;;  %s485_s4 = int_to_ptr.vmem [resolvable:$true] %s484_s4  ;;  %s487_s7 = int_to_ptr.hbm [resolvable:$true] %s486_s7 }
  0x45   : > { %443 = vmatpush.bf16.msra.mxu2 %v623_v59  ;;  %s472_s16 = scalar_lea.sflag [#allocation4], %s1084_s11  ;;  %s897_s8 = sshra.s32 %s487_s7, 4  ;;  %s898_s8 = int_to_ptr.hbm [resolvable:$true] %s897_s8 }
  0x46   : > { %432 = vmatpush.bf16.msra.mxu1 %v659_v4  ;;  %v243_v22 = vsel %vm242_vm6, 0, %v238_v21  ;;  %s899_s17 = scalar_lea.hbm %s898_s8, 32  ;;  %s903_s22 = scalar_lea.hbm %s1142_s3, 64 }
  0x47   : > { %689 = vmatmul.msk.bf16.vlgmr.msra.gmra.mxu3 %vm253_vm3, %v250_v11  ;;  %p900_p1 = scmp.ne.s32.totalorder %s898_s8, %s899_s17  ;;  %p904_p11 = scmp.lt.s32.totalorder %s898_s8, %s1142_s3 }
  0x48   : > { %416 = vmatpush.bf16.msra.mxu0 %v611_v5  ;;  %p905_p2 = scmp.lt.s32.totalorder %s903_s22, %s899_s17 }
  0x49   : > { %444 = vmatpush.bf16.msra.mxu2 %v615_v6  ;;  %688 = vmatmul.msk.bf16.vlgmr.msra.gmra.mxu1 %vm253_vm3, %v250_v11  ;;  %p901_p4 = pnand %p900_p1, %p1051_p3 }
  0x4a   : > { %p906_p9 = por %p905_p2, %p904_p11 }
  0x4b   : > { %p902_p8 = pneg %p901_p4 }
  0x4c   : > { %417 = vmatpush.bf16.msra.mxu0 %v603_v12 }
  0x4d   : > { %445 = vmatpush.bf16.msra.mxu2 %v607_v13  ;;  %p907_p10 = pnand %p906_p9, %p902_p8 }
  0x50   : > { %418 = vmatpush.bf16.msra.mxu0 %v595_v18 }
  0x51   : > { %446 = vmatpush.bf16.msra.mxu2 %v599_v19 }
  0xa9   : > { %v252_v23 = vpop.permute.xlu0 %251 }
  0xaa   : > { %v256_v24 = vsel %vm253_vm3, %v243_v22, %v252_v23 }
  0xab   : > { %419 = vmatmul.bf16.vlgmr.msra.gmra.mxu0 %v256_v24  ;;  %447 = vmatmul.bf16.vlgmr.msra.gmra.mxu2 %v256_v24 }
  0xc6   : > { %v434_v28 = vpop.f32.mrf.mxu1 }
  0xca   : > { %v462_v32 = vpop.f32.mrf.mxu3 }
  0xce   : > { %v436_v38 = vpop.f32.mrf.mxu1 }
  0xd2   : > { %v464_v42 = vpop.f32.mrf.mxu3 }
 0x128   : > { %v420_v27 = vpop.f32.mrf.mxu0 }
 0x129   : > { %v421_v29 = vadd.f32 %v420_v27, %v284_v26 }
 0x12b   : > { %v435_v30 = vadd.f32 %v434_v28, %v421_v29 }
 0x12d   : > { %467 = vst [vmem:[%s221_s29] sm:$0xff] %v435_v30 }
 0x12e   : > { %v448_v33 = vpop.f32.mrf.mxu2 }
 0x12f   : > { %v449_v34 = vadd.f32 %v448_v33, %v285_v31 }
 0x130   : > { %v422_v35 = vpop.f32.mrf.mxu0 }
 0x131   : > { %v463_v36 = vadd.f32 %v462_v32, %v449_v34  ;;  %v423_v37 = vadd.f32 %v422_v35, %v284_v26 }
 0x133   : > { %468 = vst [vmem:[%s221_s29 + $0x8] sm:$0xff] %v463_v36  ;;  %v437_v39 = vadd.f32 %v436_v38, %v423_v37 }
 0x135   : > { %469 = vst [vmem:[%s221_s29 + $0x10] sm:$0xff] %v437_v39 }
 0x136   : > { %v450_v40 = vpop.f32.mrf.mxu2 }
 0x137   : > { %v451_v41 = vadd.f32 %v450_v40, %v285_v31 }
 0x139   : > { %v465_v43 = vadd.f32 %v464_v42, %v451_v41 }
 0x13b   : > { %470 = vst [vmem:[%s221_s29 + $0x18] sm:$0xff] %v465_v43 }
 0x13c   : > { %910 = shalt.err (!%p907_p10)
}
 0x13d   : > { %s960_s11 = smov 256   ;;  %s961_s5 = smov 16  }
 0x13e   : > { %731 = dma.vmem_to_hbm [thread:$0]  (%p1051_p3), %s485_s4, 512, %s487_s7, %s472_s16, %s960_s11, %s960_s11, %s961_s5  }
 0x13f PF: > { %s501_s18 = sand.u32 1, %s941_s12   ;;  %p1148_p12 = scmp.ge.s32.totalorder %s953_s15, 2 }
 0x140   : > { %s502_s23 = scalar_lea.sflag [#allocation4], %s501_s18 }
 0x141   : > { %p745_p13 = pnand %p1148_p12, %p1017_p6 }
 0x143   : > { %p746_p0 = pneg %p745_p13 }
 0x145   : > { %936 = dma.done.wait (%p746_p0), %s502_s23, 512  }
 0x146   : > { %938 = vsyncadd (%p746_p0), %s502_s23, 4294966784  ;;  %p17_p5 = scmp.ge.s32.totalorder %s1041_s6, 4   ;;  %s1149_s12 = smov %s945_s13 }
 0x147   : > { %s1150_s13 = smov %s949_s14  ;;  %s1151_s14 = smov %s1057_s10 }
 0x148   : > { %s1152_s15 = smov %s1041_s6  ;;  %19 = sbr.rel (!%p17_p5) target bundleno = 6 (0x6), region = 85 }
 0x14d   :  { %508 = vsyncpa [#allocation3], 1 }
 0x14e   :  { %510 = vsyncpa [#allocation3 + $0x1], 1 }
 0x14f   :  { %511 = vsyncpa [#allocation6], 1 }
 0x150   :  { %512 = vsyncpa [#allocation4], 1 }
 0x151   :  { %514 = vsyncpa [#allocation4 + $0x1], 1 }

</bundles_post_ra>
